<compile_context>
chip_gen: v7x
topology: tpu7x:2x2x1
jax: 0.10.0
libtpu: 0.0.40
codegen_flags: <defaults>
</compile_context>

<pallas_src>
import functools

import jax
import jax.numpy as jnp
from jax.experimental import pallas as pl
from jax.experimental.pallas import tpu as pltpu


def _diff_loss_kernel(x1_ref, x2_ref, out_ref, s11_ref, s22_ref, s12_ref, *, eps):
    k = pl.program_id(0)

    @pl.when(k == 0)
    def _():
        s11_ref[...] = jnp.zeros_like(s11_ref)
        s22_ref[...] = jnp.zeros_like(s22_ref)
        s12_ref[...] = jnp.zeros_like(s12_ref)

    x1 = x1_ref[...]                                        # (B, tD) f32
    x2 = x2_ref[...]                                        # (B, tD) f32

    # Center each feature column over the batch dimension (dim=0, keepdims).
    # Each grid step sees the full batch for its feature chunk, so this is
    # exact per chunk.
    c1 = x1 - jnp.mean(x1, axis=0, keepdims=True)
    c2 = x2 - jnp.mean(x2, axis=0, keepdims=True)

    # Per-row sufficient statistics, accumulated across feature chunks.
    s11_ref[...] += jnp.sum(c1 * c1, axis=1, keepdims=True)  # (B, 1)
    s22_ref[...] += jnp.sum(c2 * c2, axis=1, keepdims=True)  # (B, 1)
    s12_ref[...] += jnp.sum(c1 * c2, axis=1, keepdims=True)  # (B, 1)

    @pl.when(k == pl.num_programs(0) - 1)
    def _():
        s11 = s11_ref[...]
        s22 = s22_ref[...]
        s12 = s12_ref[...]
        n1 = jnp.sqrt(s11)                                   # row L2 norms
        n2 = jnp.sqrt(s22)
        inv1 = 1.0 / (n1 + eps)
        inv2 = 1.0 / (n2 + eps)
        # ||c1*inv1 - c2*inv2||^2 expanded with the accumulated statistics.
        d2 = s11 * (inv1 * inv1) + s22 * (inv2 * inv2) - 2.0 * s12 * (inv1 * inv2)
        dn = jnp.sqrt(jnp.maximum(d2, 0.0))                  # (B, 1)
        mean_dn = jnp.mean(dn, axis=0, keepdims=True)        # (1, 1)
        out_ref[...] = 1.0 / mean_dn                         # exact divide


def diff_loss(input1, input2, *, eps=1e-6, max_block_d=2048):
    """Pallas forward for DiffLoss: returns a scalar jnp.float32."""
    B = input1.shape[0]
    x1 = jnp.reshape(input1, (B, -1)).astype(jnp.float32)    # (B, D)
    x2 = jnp.reshape(input2, (B, -1)).astype(jnp.float32)    # (B, D)
    D = x1.shape[1]

    # Feature-axis tiling: single full-width block when it fits comfortably,
    # otherwise lane-aligned chunks of max_block_d with exact zero padding.
    if D <= max_block_d:
        tD = D
        Dp = D
    else:
        tD = max_block_d                                      # multiple of 128
        Dp = pl.cdiv(D, tD) * tD
    if Dp != D:
        pad = Dp - D
        x1 = jnp.pad(x1, ((0, 0), (0, pad)))
        x2 = jnp.pad(x2, ((0, 0), (0, pad)))

    grid = (Dp // tD,)
    kernel = functools.partial(_diff_loss_kernel, eps=float(eps))

    out = pl.pallas_call(
        kernel,
        out_shape=jax.ShapeDtypeStruct((1, 1), jnp.float32),
        grid_spec=pltpu.PrefetchScalarGridSpec(
            num_scalar_prefetch=0,
            grid=grid,
            in_specs=[
                pl.BlockSpec((B, tD), lambda k: (0, k)),
                pl.BlockSpec((B, tD), lambda k: (0, k)),
            ],
            out_specs=pl.BlockSpec((1, 1), lambda k: (0, 0)),
            scratch_shapes=[
                pltpu.VMEM((B, 1), jnp.float32),
                pltpu.VMEM((B, 1), jnp.float32),
                pltpu.VMEM((B, 1), jnp.float32),
            ],
        ),
        compiler_params=pltpu.CompilerParams(
            dimension_semantics=("arbitrary",),
        ),
    )(x1, x2)
    return out[0, 0]


def _reference_diff_loss(input1, input2, eps=1e-6):
    """Pure-JAX reference mirroring the PyTorch forward."""
    B = input1.shape[0]
    x1 = jnp.reshape(input1, (B, -1)).astype(jnp.float32)
    x2 = jnp.reshape(input2, (B, -1)).astype(jnp.float32)
    x1 = x1 - jnp.mean(x1, axis=0, keepdims=True)
    x2 = x2 - jnp.mean(x2, axis=0, keepdims=True)
    n1 = jnp.linalg.norm(x1, ord=2, axis=1, keepdims=True)
    n2 = jnp.linalg.norm(x2, ord=2, axis=1, keepdims=True)
    l1 = x1 / (n1 + eps)
    l2 = x2 / (n2 + eps)
    dn = jnp.linalg.norm(l1 - l2, ord=2, axis=1)
    return 1.0 / jnp.mean(dn)


if __name__ == "__main__":
    # Small shapes consistent with the module: (batch, seq, hidden) = (8, 16, 32)
    # -> flattened feature dim D = 512 (lane-aligned), B = 8 (sublane-aligned).
    B, N, H = 8, 16, 32

    key = jax.random.PRNGKey(0)
    k1, k2 = jax.random.split(key)
    input1 = jax.random.normal(k1, (B, N, H), jnp.float32)
    input2 = jax.random.normal(k2, (B, N, H), jnp.float32)

    loss = diff_loss(input1, input2)
    loss = jax.block_until_ready(loss)

    ref = _reference_diff_loss(input1, input2)
    assert loss.shape == ()
    assert jnp.allclose(loss, ref, atol=1e-6, rtol=1e-4), (
        f"mismatch vs reference: {loss} vs {ref}")

    # Exercise the tiled (multi-chunk, padded) path as well.
    B2, N2, H2 = 8, 40, 128                                   # D = 5120 > 2048
    i1 = jax.random.normal(jax.random.PRNGKey(1), (B2, N2, H2), jnp.float32)
    i2 = jax.random.normal(jax.random.PRNGKey(2), (B2, N2, H2), jnp.float32)
    loss2 = jax.block_until_ready(diff_loss(i1, i2))
    ref2 = _reference_diff_loss(i1, i2)
    assert jnp.allclose(loss2, ref2, atol=1e-6, rtol=1e-4), (
        f"mismatch vs reference (tiled): {loss2} vs {ref2}")

    print("KERNEL_OK")
</pallas_src>

<mosaic_0001>
module attributes {stable_mosaic.version = 11 : i64} {
  func.func @_diff_loss_kernel(%arg0: i32, %arg1: memref<8x512xf32, #tpu.memory_space<vmem>>, %arg2: memref<8x512xf32, #tpu.memory_space<vmem>>, %arg3: memref<1x1xf32, #tpu.memory_space<vmem>>, %arg4: memref<8x1xf32, #tpu.memory_space<vmem>>, %arg5: memref<8x1xf32, #tpu.memory_space<vmem>>, %arg6: memref<8x1xf32, #tpu.memory_space<vmem>>) attributes {dimension_semantics = [#tpu.dimension_semantics<arbitrary>], iteration_bounds = array<i64: 1>, scalar_prefetch = 0 : i64, scratch_operands = 3 : i64, tpu.core_type = #tpu.core_type<tc>, window_params = [{transform_indices = @transform_0, window_bounds = array<i64: 8, 512>}, {transform_indices = @transform_1, window_bounds = array<i64: 8, 512>}, {pipeline_mode = #tpu.pipeline_mode<synchronous>, transform_indices = @transform_2, window_bounds = array<i64: 1, 1>}]} {
    %c0_i32 = arith.constant 0 : i32
    %0 = arith.cmpi eq, %arg0, %c0_i32 : i32
    %1 = arith.extui %0 : i1 to i32
    %c0_i32_0 = arith.constant 0 : i32
    %2 = arith.cmpi ne, %1, %c0_i32_0 : i32
    scf.if %2 {
      %cst_24 = arith.constant 0.000000e+00 : f32
      %38 = vector.broadcast %cst_24 : f32 to vector<8x1xf32>
      %c0_25 = arith.constant 0 : index
      %c0_26 = arith.constant 0 : index
      %39 = vector.load %arg4[%c0_25, %c0_26] : memref<8x1xf32, #tpu.memory_space<vmem>>, vector<8x1xf32>
      tpu.vector_store %arg4[%c0_25, %c0_26], %38 {strides = array<i32>} : memref<8x1xf32, #tpu.memory_space<vmem>>, vector<8x1xf32>,
      %cst_27 = arith.constant 0.000000e+00 : f32
      %40 = vector.broadcast %cst_27 : f32 to vector<8x1xf32>
      %c0_28 = arith.constant 0 : index
      %c0_29 = arith.constant 0 : index
      %41 = vector.load %arg5[%c0_28, %c0_29] : memref<8x1xf32, #tpu.memory_space<vmem>>, vector<8x1xf32>
      tpu.vector_store %arg5[%c0_28, %c0_29], %40 {strides = array<i32>} : memref<8x1xf32, #tpu.memory_space<vmem>>, vector<8x1xf32>,
      %cst_30 = arith.constant 0.000000e+00 : f32
      %42 = vector.broadcast %cst_30 : f32 to vector<8x1xf32>
      %c0_31 = arith.constant 0 : index
      %c0_32 = arith.constant 0 : index
      %43 = vector.load %arg6[%c0_31, %c0_32] : memref<8x1xf32, #tpu.memory_space<vmem>>, vector<8x1xf32>
      tpu.vector_store %arg6[%c0_31, %c0_32], %42 {strides = array<i32>} : memref<8x1xf32, #tpu.memory_space<vmem>>, vector<8x1xf32>,
    } else {
    }
    %c0 = arith.constant 0 : index
    %c0_1 = arith.constant 0 : index
    %3 = vector.load %arg1[%c0, %c0_1] : memref<8x512xf32, #tpu.memory_space<vmem>>, vector<8x512xf32>
    %c0_2 = arith.constant 0 : index
    %c0_3 = arith.constant 0 : index
    %4 = vector.load %arg2[%c0_2, %c0_3] : memref<8x512xf32, #tpu.memory_space<vmem>>, vector<8x512xf32>
    %cst = arith.constant dense<0.000000e+00> : vector<512xf32>
    %5 = vector.multi_reduction <add>, %3, %cst [0] : vector<8x512xf32> to vector<512xf32>
    %6 = vector.shape_cast %5 : vector<512xf32> to vector<1x512xf32>
    %cst_4 = arith.constant 8.000000e+00 : f32
    %7 = vector.broadcast %cst_4 : f32 to vector<1x512xf32>
    %8 = arith.divf %6, %7 : vector<1x512xf32>
    %9 = vector.broadcast %8 : vector<1x512xf32> to vector<8x512xf32>
    %10 = arith.subf %3, %9 : vector<8x512xf32>
    %cst_5 = arith.constant dense<0.000000e+00> : vector<512xf32>
    %11 = vector.multi_reduction <add>, %4, %cst_5 [0] : vector<8x512xf32> to vector<512xf32>
    %12 = vector.shape_cast %11 : vector<512xf32> to vector<1x512xf32>
    %cst_6 = arith.constant 8.000000e+00 : f32
    %13 = vector.broadcast %cst_6 : f32 to vector<1x512xf32>
    %14 = arith.divf %12, %13 : vector<1x512xf32>
    %15 = vector.broadcast %14 : vector<1x512xf32> to vector<8x512xf32>
    %16 = arith.subf %4, %15 : vector<8x512xf32>
    %c0_7 = arith.constant 0 : index
    %c0_8 = arith.constant 0 : index
    %17 = vector.load %arg4[%c0_7, %c0_8] : memref<8x1xf32, #tpu.memory_space<vmem>>, vector<8x1xf32>
    %18 = arith.mulf %10, %10 : vector<8x512xf32>
    %cst_9 = arith.constant dense<0.000000e+00> : vector<8xf32>
    %19 = vector.multi_reduction <add>, %18, %cst_9 [1] : vector<8x512xf32> to vector<8xf32>
    %20 = vector.shape_cast %19 : vector<8xf32> to vector<8x1xf32>
    %21 = arith.addf %17, %20 : vector<8x1xf32>
    %c0_10 = arith.constant 0 : index
    %c0_11 = arith.constant 0 : index
    %22 = vector.load %arg4[%c0_10, %c0_11] : memref<8x1xf32, #tpu.memory_space<vmem>>, vector<8x1xf32>
    tpu.vector_store %arg4[%c0_10, %c0_11], %21 {strides = array<i32>} : memref<8x1xf32, #tpu.memory_space<vmem>>, vector<8x1xf32>,
    %c0_12 = arith.constant 0 : index
    %c0_13 = arith.constant 0 : index
    %23 = vector.load %arg5[%c0_12, %c0_13] : memref<8x1xf32, #tpu.memory_space<vmem>>, vector<8x1xf32>
    %24 = arith.mulf %16, %16 : vector<8x512xf32>
    %cst_14 = arith.constant dense<0.000000e+00> : vector<8xf32>
    %25 = vector.multi_reduction <add>, %24, %cst_14 [1] : vector<8x512xf32> to vector<8xf32>
    %26 = vector.shape_cast %25 : vector<8xf32> to vector<8x1xf32>
    %27 = arith.addf %23, %26 : vector<8x1xf32>
    %c0_15 = arith.constant 0 : index
    %c0_16 = arith.constant 0 : index
    %28 = vector.load %arg5[%c0_15, %c0_16] : memref<8x1xf32, #tpu.memory_space<vmem>>, vector<8x1xf32>
    tpu.vector_store %arg5[%c0_15, %c0_16], %27 {strides = array<i32>} : memref<8x1xf32, #tpu.memory_space<vmem>>, vector<8x1xf32>,
    %c0_17 = arith.constant 0 : index
    %c0_18 = arith.constant 0 : index
    %29 = vector.load %arg6[%c0_17, %c0_18] : memref<8x1xf32, #tpu.memory_space<vmem>>, vector<8x1xf32>
    %30 = arith.mulf %10, %16 : vector<8x512xf32>
    %cst_19 = arith.constant dense<0.000000e+00> : vector<8xf32>
    %31 = vector.multi_reduction <add>, %30, %cst_19 [1] : vector<8x512xf32> to vector<8xf32>
    %32 = vector.shape_cast %31 : vector<8xf32> to vector<8x1xf32>
    %33 = arith.addf %29, %32 : vector<8x1xf32>
    %c0_20 = arith.constant 0 : index
    %c0_21 = arith.constant 0 : index
    %34 = vector.load %arg6[%c0_20, %c0_21] : memref<8x1xf32, #tpu.memory_space<vmem>>, vector<8x1xf32>
    tpu.vector_store %arg6[%c0_20, %c0_21], %33 {strides = array<i32>} : memref<8x1xf32, #tpu.memory_space<vmem>>, vector<8x1xf32>,
    %c0_i32_22 = arith.constant 0 : i32
    %35 = arith.cmpi eq, %arg0, %c0_i32_22 : i32
    %36 = arith.extui %35 : i1 to i32
    %c0_i32_23 = arith.constant 0 : i32
    %37 = arith.cmpi ne, %36, %c0_i32_23 : i32
    scf.if %37 {
      %c0_24 = arith.constant 0 : index
      %c0_25 = arith.constant 0 : index
      %38 = vector.load %arg4[%c0_24, %c0_25] : memref<8x1xf32, #tpu.memory_space<vmem>>, vector<8x1xf32>
      %c0_26 = arith.constant 0 : index
      %c0_27 = arith.constant 0 : index
      %39 = vector.load %arg5[%c0_26, %c0_27] : memref<8x1xf32, #tpu.memory_space<vmem>>, vector<8x1xf32>
      %c0_28 = arith.constant 0 : index
      %c0_29 = arith.constant 0 : index
      %40 = vector.load %arg6[%c0_28, %c0_29] : memref<8x1xf32, #tpu.memory_space<vmem>>, vector<8x1xf32>
      %41 = math.sqrt %38 : vector<8x1xf32>
      %42 = math.sqrt %39 : vector<8x1xf32>
      %cst_30 = arith.constant 9.99999997E-7 : f32
      %43 = vector.broadcast %cst_30 : f32 to vector<8x1xf32>
      %44 = arith.addf %41, %43 : vector<8x1xf32>
      %cst_31 = arith.constant 1.000000e+00 : f32
      %45 = vector.broadcast %cst_31 : f32 to vector<8x1xf32>
      %46 = arith.divf %45, %44 : vector<8x1xf32>
      %cst_32 = arith.constant 9.99999997E-7 : f32
      %47 = vector.broadcast %cst_32 : f32 to vector<8x1xf32>
      %48 = arith.addf %42, %47 : vector<8x1xf32>
      %cst_33 = arith.constant 1.000000e+00 : f32
      %49 = vector.broadcast %cst_33 : f32 to vector<8x1xf32>
      %50 = arith.divf %49, %48 : vector<8x1xf32>
      %51 = arith.mulf %46, %46 : vector<8x1xf32>
      %52 = arith.mulf %38, %51 : vector<8x1xf32>
      %53 = arith.mulf %50, %50 : vector<8x1xf32>
      %54 = arith.mulf %39, %53 : vector<8x1xf32>
      %55 = arith.addf %52, %54 : vector<8x1xf32>
      %cst_34 = arith.constant 2.000000e+00 : f32
      %56 = vector.broadcast %cst_34 : f32 to vector<8x1xf32>
      %57 = arith.mulf %56, %40 : vector<8x1xf32>
      %58 = arith.mulf %46, %50 : vector<8x1xf32>
      %59 = arith.mulf %57, %58 : vector<8x1xf32>
      %60 = arith.subf %55, %59 : vector<8x1xf32>
      %cst_35 = arith.constant 0.000000e+00 : f32
      %61 = vector.broadcast %cst_35 : f32 to vector<8x1xf32>
      %62 = arith.maximumf %60, %61 : vector<8x1xf32>
      %63 = math.sqrt %62 : vector<8x1xf32>
      %cst_36 = arith.constant dense<0.000000e+00> : vector<1xf32>
      %64 = vector.multi_reduction <add>, %63, %cst_36 [0] : vector<8x1xf32> to vector<1xf32>
      %65 = vector.shape_cast %64 : vector<1xf32> to vector<1x1xf32>
      %cst_37 = arith.constant 8.000000e+00 : f32
      %66 = vector.broadcast %cst_37 : f32 to vector<1x1xf32>
      %67 = arith.divf %65, %66 : vector<1x1xf32>
      %cst_38 = arith.constant 1.000000e+00 : f32
      %68 = vector.broadcast %cst_38 : f32 to vector<1x1xf32>
      %69 = arith.divf %68, %67 : vector<1x1xf32>
      %c0_39 = arith.constant 0 : index
      %c0_40 = arith.constant 0 : index
      %70 = vector.load %arg3[%c0_39, %c0_40] : memref<1x1xf32, #tpu.memory_space<vmem>>, vector<1x1xf32>
      tpu.vector_store %arg3[%c0_39, %c0_40], %69 {strides = array<i32>} : memref<1x1xf32, #tpu.memory_space<vmem>>, vector<1x1xf32>,
    } else {
    }
    return
  }
  func.func @transform_0(%arg0: i32) -> (i32, i32) {
    %c0_i32 = arith.constant 0 : i32
    %c0_i32_0 = arith.constant 0 : i32
    return %c0_i32, %arg0 : i32, i32
  }
  func.func @transform_1(%arg0: i32) -> (i32, i32) {
    %c0_i32 = arith.constant 0 : i32
    %c0_i32_0 = arith.constant 0 : i32
    return %c0_i32, %arg0 : i32, i32
  }
  func.func @transform_2(%arg0: i32) -> (i32, i32) {
    %c0_i32 = arith.constant 0 : i32
    %c0_i32_0 = arith.constant 0 : i32
    %c0_i32_1 = arith.constant 0 : i32
    return %c0_i32, %c0_i32_0 : i32, i32
  }
}

</mosaic_0001>

<bundles_post_ra>
// kernel: tpu_custom_call.1
= control target key start
LH: loop header
LB: loop body
LE: loop exit
PB: predicated region body
PF: predicated region fallthrough
CT: control target
= control target key end

     0   :  { %7 = vsyncpa [#allocation6], 0  ;;  %s390_s0 = inlined_call_operand.hbm [shape: f32[8,512], index: 0, kind: input, shape index: {}]   ;;  %s391_s1 = inlined_call_operand.hbm [shape: f32[8,512], index: 1, kind: input, shape index: {}]   ;;  %s392_s2 = inlined_call_operand.hbm [shape: f32[1,1], index: 2, kind: output, shape index: {}]  }
   0x1   :  { %8 = vsyncpa [#allocation9], 0 }
   0x2   :  { %9 = vsyncpa [#allocation7], 0  ;;  %s313_s9 = smov [#allocation5]   ;;  %s314_s11 = smov [#allocation8]  }
   0x3   :  { %s16_s10 = sshll.u32 %s313_s9, 4  ;;  %s26_s12 = sshll.u32 %s314_s11, 4  ;;  %s17_s10 = int_to_ptr.vmem [resolvable:$true] %s16_s10  ;;  %s27_s12 = int_to_ptr.vmem [resolvable:$true] %s26_s12 }
   0x4   :  { %s241_s15 = scalar_lea.hbm %s390_s0, 512 }
   0x5   :  { %p242_p0 = scmp.ne.s32.totalorder %s390_s0, %s241_s15  ;;  %p245_p1 = scmp.lt.u32.totalorder %s241_s15, %s390_s0 }
   0x7   :  { %p247_p2 = pnand %p245_p1, %p242_p0 }
   0x9   :  { %250 = shalt.err (!%p247_p2)
}
   0xa   :  { %s251_s20 = scalar_lea.vmem %s17_s10, 512  ;;  %p256_p4 = scmp.lt.s32.totalorder %s17_s10, %s17_s10 }
   0xb   :  { %p252_p3 = scmp.ne.s32.totalorder %s17_s10, %s251_s20  ;;  %p257_p5 = scmp.lt.s32.totalorder %s251_s20, %s251_s20 }
   0xd   :  { %p258_p6 = por %p257_p5, %p256_p4 }
   0xf   :  { %p259_p7 = pnand %p258_p6, %p252_p3 }
  0x11   :  { %262 = shalt.err (!%p259_p7)
}
  0x12   :  { %19 = dma.hbm_to_vmem [thread:$0]  %s390_s0, 512, %s17_s10, [#allocation6]  }
  0x13   :  { %s263_s25 = scalar_lea.hbm %s391_s1, 512 }
  0x14   :  { %p264_p8 = scmp.ne.s32.totalorder %s391_s1, %s263_s25  ;;  %p267_p9 = scmp.lt.u32.totalorder %s263_s25, %s391_s1 }
  0x16   :  { %p269_p10 = pnand %p267_p9, %p264_p8 }
  0x18   :  { %272 = shalt.err (!%p269_p10)
}
  0x19   :  { %s273_s30 = scalar_lea.vmem %s27_s12, 512  ;;  %p278_p12 = scmp.lt.s32.totalorder %s27_s12, %s27_s12 }
  0x1a   :  { %p274_p11 = scmp.ne.s32.totalorder %s27_s12, %s273_s30  ;;  %p279_p13 = scmp.lt.s32.totalorder %s273_s30, %s273_s30 }
  0x1c   :  { %p280_p0 = por %p279_p13, %p278_p12 }
  0x1e   :  { %p281_p1 = pnand %p280_p0, %p274_p11 }
  0x20   :  { %284 = shalt.err (!%p281_p1)
}
  0x21   :  { %29 = dma.hbm_to_vmem [thread:$0]  %s391_s1, 512, %s27_s12, [#allocation9]  }
  0x22   :  { %307 = dma.done.wait [#allocation6], 512  }
  0x23   :  { %308 = vsyncadd [#allocation6], 4294966784 }
  0x24   :  { %309 = dma.done.wait [#allocation9], 512  }
  0x25   :  { %310 = vsyncadd [#allocation9], 4294966784  ;;  %vm40_vm0 = vcmask 7168   ;;  %v315_v0 = vmov 0.0   ;;  %v44_v1 = vld [vmem:[#allocation5] sm:$0xff]  ;;  %v45_v2 = vld [vmem:[#allocation5 + $0x8] sm:$0xff] }
  0x26   :  { %41 = vst.msk [vmem:[#allocation2] sm:$0xff] %vm40_vm0, %v315_v0  ;;  %42 = vst.msk [vmem:[#allocation3] sm:$0xff] %vm40_vm0, %v315_v0  ;;  %v46_v3 = vld [vmem:[#allocation5 + $0x10] sm:$0xff]  ;;  %v359_v4 = vld [vmem:[#allocation5 + $0x18] sm:$0xff]  ;;  %v52_v5 = vrot.slane %v44_v1, 4  ;;  %v58_v6 = vrot.slane %v45_v2, 4 }
  0x27   :  { %43 = vst.msk [vmem:[#allocation4] sm:$0xff] %vm40_vm0, %v315_v0  ;;  %v64_v7 = vrot.slane %v46_v3, 4  ;;  %v48_v8 = vld [vmem:[#allocation8] sm:$0xff]  ;;  %v49_v9 = vld [vmem:[#allocation8 + $0x8] sm:$0xff]  ;;  %v70_v10 = vrot.slane %v359_v4, 4  ;;  %v362_v11 = vld [vmem:[#allocation8 + $0x10] sm:$0xff] }
  0x28   :  { %v364_v12 = vld [vmem:[#allocation8 + $0x18] sm:$0xff]  ;;  %v85_v13 = vrot.slane %v48_v8, 4  ;;  %v91_v14 = vrot.slane %v49_v9, 4  ;;  %v53_v15 = vadd.f32 %v52_v5, %v44_v1  ;;  %v59_v16 = vadd.f32 %v58_v6, %v45_v2  ;;  %s316_s1 = smov [#allocation10]  }
  0x29   :  { %v65_v17 = vadd.f32 %v64_v7, %v46_v3  ;;  %v97_v18 = vrot.slane %v362_v11, 4  ;;  %v71_v19 = vadd.f32 %v70_v10, %v359_v4  ;;  %v103_v22 = vrot.slane %v364_v12, 4  ;;  %s215_s4 = sshll.u32 %s316_s1, 4  ;;  %s216_s4 = int_to_ptr.vmem [resolvable:$true] %s215_s4 }
  0x2a   :  { %v86_v20 = vadd.f32 %v85_v13, %v48_v8  ;;  %v92_v21 = vadd.f32 %v91_v14, %v49_v9  ;;  %v54_v23 = vrot.slane %v53_v15, 2  ;;  %v60_v24 = vrot.slane %v59_v16, 2  ;;  %s285_s5 = scalar_lea.vmem %s216_s4, 16  ;;  %s289_s6 = scalar_lea.vmem %s216_s4, 32 }
  0x2b   :  { %v66_v25 = vrot.slane %v65_v17, 2  ;;  %v98_v26 = vadd.f32 %v97_v18, %v362_v11  ;;  %v72_v27 = vrot.slane %v71_v19, 2  ;;  %v104_v30 = vadd.f32 %v103_v22, %v364_v12  ;;  %p286_p2 = scmp.ne.s32.totalorder %s216_s4, %s285_s5  ;;  %p290_p3 = scmp.lt.s32.totalorder %s216_s4, %s216_s4 }
  0x2c   :  { %v87_v28 = vrot.slane %v86_v20, 2  ;;  %v93_v29 = vrot.slane %v92_v21, 2  ;;  %v55_v31 = vadd.f32 %v54_v23, %v53_v15  ;;  %v61_v32 = vadd.f32 %v60_v24, %v59_v16  ;;  %p291_p4 = scmp.lt.s32.totalorder %s289_s6, %s285_s5 }
  0x2d   :  { %v67_v33 = vadd.f32 %v66_v25, %v65_v17  ;;  %v99_v34 = vrot.slane %v98_v26, 2  ;;  %v73_v35 = vadd.f32 %v72_v27, %v71_v19  ;;  %v105_v38 = vrot.slane %v104_v30, 2 }
  0x2e   :  { %v88_v36 = vadd.f32 %v87_v28, %v86_v20  ;;  %v94_v37 = vadd.f32 %v93_v29, %v92_v21  ;;  %v56_v39 = vrot.slane %v55_v31, 1  ;;  %v62_v40 = vrot.slane %v61_v32, 1  ;;  %p292_p5 = por %p291_p4, %p290_p3 }
  0x2f   :  { %v68_v41 = vrot.slane %v67_v33, 1  ;;  %v100_v42 = vadd.f32 %v99_v34, %v98_v26  ;;  %v74_v43 = vrot.slane %v73_v35, 1  ;;  %v106_v46 = vadd.f32 %v105_v38, %v104_v30  ;;  %v130_v34 = vld [vmem:[#allocation3] sm:$0xff] }
  0x30   :  { %v89_v44 = vrot.slane %v88_v36, 1  ;;  %v95_v45 = vrot.slane %v94_v37, 1  ;;  %v57_v47 = vadd.f32 %v56_v39, %v55_v31  ;;  %v63_v48 = vadd.f32 %v62_v40, %v61_v32  ;;  %v142_v32 = vld [vmem:[#allocation4] sm:$0xff]  ;;  %p293_p6 = pnand %p292_p5, %p286_p2 }
  0x31   :  { %v69_v49 = vadd.f32 %v68_v41, %v67_v33  ;;  %v101_v50 = vrot.slane %v100_v42, 1  ;;  %v75_v51 = vadd.f32 %v74_v43, %v73_v35  ;;  %v107_v54 = vrot.slane %v106_v46, 1 }
  0x32   :  { %v90_v52 = vadd.f32 %v89_v44, %v88_v36  ;;  %v96_v53 = vadd.f32 %v95_v45, %v94_v37  ;;  %v77_v55 = vmul.f32 0.125, %v57_v47  ;;  %v78_v56 = vmul.f32 0.125, %v63_v48 }
  0x33   :  { %v79_v57 = vmul.f32 0.125, %v69_v49  ;;  %v102_v58 = vadd.f32 %v101_v50, %v100_v42  ;;  %v80_v59 = vmul.f32 0.125, %v75_v51  ;;  %v108_v60 = vadd.f32 %v107_v54, %v106_v46 }
  0x34   :  { %v109_v61 = vmul.f32 0.125, %v90_v52  ;;  %v110_v62 = vmul.f32 0.125, %v96_v53  ;;  %v81_v63 = vsub.f32 %v44_v1, %v77_v55  ;;  %v82_v0 = vsub.f32 %v45_v2, %v78_v56 }
  0x35   :  { %v83_v5 = vsub.f32 %v46_v3, %v79_v57  ;;  %v111_v6 = vmul.f32 0.125, %v102_v58  ;;  %v84_v7 = vsub.f32 %v359_v4, %v80_v59  ;;  %v112_v10 = vmul.f32 0.125, %v108_v60 }
  0x36   :  { %v113_v13 = vsub.f32 %v48_v8, %v109_v61  ;;  %v114_v14 = vsub.f32 %v49_v9, %v110_v62  ;;  %v118_v15 = vmul.f32 %v81_v63, %v81_v63  ;;  %v119_v16 = vmul.f32 %v82_v0, %v82_v0 }
  0x37   :  { %v120_v17 = vmul.f32 %v83_v5, %v83_v5  ;;  %v115_v18 = vsub.f32 %v362_v11, %v111_v6  ;;  %v121_v19 = vmul.f32 %v84_v7, %v84_v7  ;;  %v116_v20 = vsub.f32 %v364_v12, %v112_v10  ;;  %v117_v12 = vld [vmem:[#allocation2] sm:$0xff] }
  0x38   :  { %v131_v21 = vmul.f32 %v113_v13, %v113_v13  ;;  %v132_v22 = vmul.f32 %v114_v14, %v114_v14  ;;  %v122_v23 = vadd.f32 %v119_v16, %v118_v15  ;;  %v143_v2 = vmul.f32 %v113_v13, %v81_v63 }
  0x39   :  { %v133_v1 = vmul.f32 %v115_v18, %v115_v18  ;;  %v144_v3 = vmul.f32 %v114_v14, %v82_v0  ;;  %v145_v25 = vmul.f32 %v115_v18, %v83_v5  ;;  %v134_v26 = vmul.f32 %v116_v20, %v116_v20 }
  0x3a   :  { %v135_v24 = vadd.f32 %v132_v22, %v131_v21  ;;  %v123_v4 = vadd.f32 %v122_v23, %v120_v17  ;;  %v146_v8 = vmul.f32 %v116_v20, %v84_v7  ;;  %vm207_vm7 = vcmask 0  }
  0x3b   :  { %v147_v9 = vadd.f32 %v144_v3, %v143_v2 }
  0x3c   :  { %v136_v27 = vadd.f32 %v135_v24, %v133_v1  ;;  %v124_v28 = vadd.f32 %v123_v4, %v121_v19 }
  0x3d   :  { %v148_v29 = vadd.f32 %v147_v9, %v145_v25 }
  0x3e   :  { %125 = vadd.xlane.f32.xlu0 %v124_v28  ;;  %v137_v11 = vadd.f32 %v136_v27, %v134_v26 }
  0x3f   :  { %v149_v30 = vadd.f32 %v148_v29, %v146_v8 }
  0x41   :  { %150 = vadd.xlane.f32.xlu1 %v149_v30 }
  0x42   :  { %138 = vadd.xlane.f32.xlu0 %v137_v11 }
  0xcb   :  { %v126_v31 = vpop.xlane.xlu0 %125 }
  0xcc   :  { %v127_v33 = vadd.f32 %v126_v31, %v117_v12 }
  0xce   :  { %v151_v35 = vpop.xlane.xlu1 %150  ;;  %129 = vst.msk [vmem:[#allocation2] sm:$0xff] %vm40_vm0, %v127_v33 }
  0xcf   :  { %v152_v36 = vadd.f32 %v151_v35, %v142_v32  ;;  %v139_v37 = vpop.xlane.xlu0 %138 }
  0xd0   :  { %v140_v38 = vadd.f32 %v139_v37, %v130_v34 }
  0xd1   :  { %153 = vst.msk [vmem:[#allocation4] sm:$0xff] %vm40_vm0, %v152_v36 }
  0xd2   :  { %141 = vst.msk [vmem:[#allocation3] sm:$0xff] %vm40_vm0, %v140_v38 }
  0xd5   :  { %v157_v39 = vld [vmem:[#allocation2] sm:$0xff] }
  0xd6   :  { %229 = vrsqrt.f32 %v157_v39  ;;  %vm162_vm1 = vcmp.eq.f32.partialorder %v157_v39, inf  ;;  %v165_v43 = vand.u32 2147483648, %v157_v39  ;;  %vm164_vm2 = vcmp.eq.f32.partialorder %v157_v39, 0.0 }
  0xd8   :  { %v159_v54 = vld [vmem:[#allocation4] sm:$0xff] }
  0xd9   :  { %v158_v40 = vld [vmem:[#allocation3] sm:$0xff]  ;;  %v185_v58 = vmul.f32 2.0, %v159_v54 }
  0xda   :  { %231 = vrsqrt.f32 %v158_v40  ;;  %vm169_vm3 = vcmp.eq.f32.partialorder %v158_v40, inf  ;;  %v172_v49 = vand.u32 2147483648, %v158_v40  ;;  %vm171_vm4 = vcmp.eq.f32.partialorder %v158_v40, 0.0 }
  0xe0   :  { %v230_v41 = vpop.eup %229 }
  0xe1   :  { %v161_v42 = vmul.f32 %v230_v41, %v157_v39 }
  0xe3   :  { %v163_v44 = vsel %vm162_vm1, %v157_v39, %v161_v42 }
  0xe4   :  { %v232_v45 = vpop.eup %231  ;;  %v166_v46 = vsel %vm164_vm2, %v165_v43, %v163_v44 }
  0xe5   :  { %v174_v47 = vadd.f32 1e-06, %v166_v46  ;;  %v168_v48 = vmul.f32 %v232_v45, %v158_v40 }
  0xe7   :  { %v170_v50 = vsel %vm169_vm3, %v158_v40, %v168_v48  ;;  %233 = vrcp.f32 %v174_v47 }
  0xe8   :  { %v173_v51 = vsel %vm171_vm4, %v172_v49, %v170_v50 }
  0xe9   :  { %v177_v52 = vadd.f32 1e-06, %v173_v51 }
  0xeb   :  { %235 = vrcp.f32 %v177_v52 }
  0xf1   :  { %v234_v53 = vpop.eup %233 }
  0xf2   :  { %v180_v55 = vmul.f32 %v234_v53, %v234_v53 }
  0xf4   :  { %v181_v60 = vmul.f32 %v180_v55, %v157_v39 }
  0xf5   :  { %v236_v56 = vpop.eup %235 }
  0xf6   :  { %v182_v57 = vmul.f32 %v236_v56, %v236_v56  ;;  %v186_v59 = vmul.f32 %v236_v56, %v234_v53 }
  0xf8   :  { %v183_v61 = vmul.f32 %v182_v57, %v158_v40  ;;  %v187_v63 = vmul.f32 %v186_v59, %v185_v58 }
  0xfa   :  { %v184_v62 = vadd.f32 %v183_v61, %v181_v60 }
  0xfc   :  { %v188_v0 = vsub.f32 %v184_v62, %v187_v63 }
  0xfe   :  { %v189_v5 = vmax.f32 %v188_v0, 0.0 }
 0x100   :  { %237 = vrsqrt.f32 %v189_v5  ;;  %vm192_vm5 = vcmp.eq.f32.partialorder %v189_v5, inf  ;;  %v195_v10 = vand.u32 2147483648, %v189_v5  ;;  %vm194_vm6 = vcmp.eq.f32.partialorder %v189_v5, 0.0 }
 0x10a   :  { %v238_v6 = vpop.eup %237 }
 0x10b   :  { %v191_v7 = vmul.f32 %v238_v6, %v189_v5 }
 0x10d   :  { %v193_v13 = vsel %vm192_vm5, %v189_v5, %v191_v7 }
 0x10e   :  { %v196_v14 = vsel %vm194_vm6, %v195_v10, %v193_v13 }
 0x10f   :  { %v197_v15 = vsel %vm40_vm0, %v196_v14, 0.0 }
 0x110   :  { %v198_v16 = vrot.slane %v197_v15, 4 }
 0x112   :  { %v199_v17 = vadd.f32 %v198_v16, %v197_v15 }
 0x114   :  { %v200_v18 = vrot.slane %v199_v17, 2 }
 0x116   :  { %v201_v19 = vadd.f32 %v200_v18, %v199_v17 }
 0x118   :  { %v202_v20 = vrot.slane %v201_v19, 1 }
 0x11a   :  { %v203_v21 = vadd.f32 %v202_v20, %v201_v19 }
 0x11c   :  { %v204_v22 = vmul.f32 0.125, %v203_v21 }
 0x11e   :  { %239 = vrcp.f32 %v204_v22 }
 0x128   :  { %v240_v23 = vpop.eup %239 }
 0x129   :  { %208 = vst.msk [vmem:[#allocation10] sm:$0x1] %vm207_vm7, %v240_v23 }
 0x12a   :  { %296 = shalt.err (!%p293_p6)
}
 0x12b   :  { %s297_s9 = scalar_lea.hbm %s392_s2, 16 }
 0x12c   :  { %p298_p7 = scmp.ne.s32.totalorder %s392_s2, %s297_s9  ;;  %p301_p8 = scmp.lt.u32.totalorder %s297_s9, %s392_s2 }
 0x12e   :  { %p303_p9 = pnand %p301_p8, %p298_p7 }
 0x130   :  { %306 = shalt.err (!%p303_p9)
}
 0x131   :  { %218 = dma.vmem_to_hbm [thread:$0]  %s216_s4, 16, %s392_s2, [#allocation7]  }
 0x132   :  { %311 = dma.done.wait [#allocation7], 16  }
 0x133   :  { %312 = vsyncadd [#allocation7], 4294967280 }
 0x134   :  { %222 = vsyncpa [#allocation6], 1 }
 0x135   :  { %223 = vsyncpa [#allocation9], 1 }
 0x136   :  { %224 = vsyncpa [#allocation7], 1 }

</bundles_post_ra>
